<compile_context>
chip_gen: v5e
topology: v5e:2x2
jax: 0.10.0
libtpu: 0.0.40
codegen_flags: <defaults>
</compile_context>

<pallas_src>
import jax
import jax.numpy as jnp
from jax.experimental import pallas as pl
from jax.experimental.pallas import tpu as pltpu

LANES = 128
SUBLANES = 8
PAD_LOGIT = -87.0            # exp(-87) ~ 1.6e-38: padded (x=-87, y=0) cells contribute exactly 0.0f
DEFAULT_BLOCK_ROWS = 512     # 512x128 f32 = 256 KiB / input / buffer (~1 MiB with double-buffering)
VMEM_LIMIT_BYTES = 32 * 1024 * 1024


def _cdiv(a, b):
    return -(-a // b)


def _focal_terms(x, y, pos_weight, gamma, alpha):
    """Per-element focal BCE-with-logits (EUP-lean, overflow/log(0)-safe)."""
    e = jnp.exp(-jnp.abs(x))                       # exp(-|x|) in (0, 1]
    l = jnp.log(1.0 + e)                           # log1p(e), well conditioned
    sp_pos = jnp.maximum(x, 0.0) + l               # softplus(x)  = -log(1 - sigmoid(x))
    sp_neg = jnp.maximum(-x, 0.0) + l              # softplus(-x) = -log(sigmoid(x))
    # BCEWithLogitsLoss(pos_weight, reduction='none')
    bce = pos_weight * y * sp_neg + (1.0 - y) * sp_pos
    r = 1.0 / (1.0 + e)                            # sigmoid(|x|)   (exact divide; keeps torch parity)
    s_lo = e * r                                   # sigmoid(-|x|) = 1 - r
    pos = x >= 0.0
    pr = jnp.where(pos, r, s_lo)                   # sigmoid(x), no exp overflow
    one_m_pr = jnp.where(pos, s_lo, r)             # 1 - sigmoid(x)
    one_m_pt = y * one_m_pr + (1.0 - y) * pr       # 1 - p_t  (exact for soft labels too)
    alpha_f = y * alpha + (1.0 - y) * (1.0 - alpha)
    if gamma == 0.0:
        mod = jnp.ones_like(one_m_pt)
    elif gamma == 1.0:
        mod = one_m_pt
    elif gamma == 1.5:                             # default: pow via sqrt, no extra exp/log
        mod = one_m_pt * jnp.sqrt(one_m_pt)
    elif gamma == 2.0:
        mod = one_m_pt * one_m_pt
    else:                                          # general gamma, clamped so log never sees 0
        mod = jnp.exp(gamma * jnp.log(jnp.maximum(one_m_pt, 1e-30)))
    return bce * alpha_f * mod


def _tile_geometry(total, max_block_rows):
    rows = _cdiv(total, LANES)
    block_rows = min(int(max_block_rows), _cdiv(rows, SUBLANES) * SUBLANES)
    block_rows = max(SUBLANES, (block_rows // SUBLANES) * SUBLANES)
    nb_total = _cdiv(rows, block_rows)
    return block_rows, nb_total


def _focal_reduce_sum(x, y, pos_weight, gamma, alpha, max_block_rows=DEFAULT_BLOCK_ROWS):
    """Sum of the focal loss over all elements, via a tiled pipelined Pallas kernel."""
    xf = x.astype(jnp.float32).reshape(-1)
    yf = y.astype(jnp.float32).reshape(-1)
    total = int(xf.shape[0])
    block_rows, nb_total = _tile_geometry(total, max_block_rows)
    num_par = 2 if nb_total >= 2 else 1            # v7x: split row-blocks across both TCs
    nbp = _cdiv(nb_total, num_par)
    rows_padded = num_par * nbp * block_rows
    pad = rows_padded * LANES - total
    # pad cells (x=-87, y=0) contribute exactly 0.0f -> no mask, no correction term
    x3 = jnp.pad(xf, (0, pad), constant_values=PAD_LOGIT).reshape(num_par * nbp, block_rows, LANES)
    y3 = jnp.pad(yf, (0, pad), constant_values=0.0).reshape(num_par * nbp, block_rows, LANES)

    def kernel(x_ref, y_ref, o_ref):
        @pl.when(pl.program_id(1) == 0)
        def _init():
            o_ref[...] = jnp.zeros_like(o_ref)
        contrib = _focal_terms(x_ref[...], y_ref[...], pos_weight, gamma, alpha)
        o_ref[...] = o_ref[...] + jnp.sum(contrib, keepdims=True)

    elems = rows_padded * LANES
    cost = pl.CostEstimate(flops=30 * elems, transcendentals=3 * elems,
                           bytes_accessed=2 * elems * 4 + num_par * 4)

    partial = pl.pallas_call(
        kernel,
        out_shape=jax.ShapeDtypeStruct((num_par, 1, 1), jnp.float32),
        grid=(num_par, nbp),
        in_specs=[pl.BlockSpec((1, block_rows, LANES), lambda p, k: (p * nbp + k, 0, 0)),
                  pl.BlockSpec((1, block_rows, LANES), lambda p, k: (p * nbp + k, 0, 0))],
        out_specs=pl.BlockSpec((1, 1, 1), lambda p, k: (p, 0, 0)),
        compiler_params=pltpu.CompilerParams(
            dimension_semantics=("parallel", "arbitrary"),
            vmem_limit_bytes=VMEM_LIMIT_BYTES),
        cost_estimate=cost,
    )(x3, y3)
    return jnp.sum(partial), total


def _focal_elementwise(x, y, pos_weight, gamma, alpha, max_block_rows=DEFAULT_BLOCK_ROWS):
    """reduction='none': per-element focal loss, tiled elementwise kernel."""
    orig_shape = x.shape
    xf = x.astype(jnp.float32).reshape(-1)
    yf = y.astype(jnp.float32).reshape(-1)
    total = int(xf.shape[0])
    block_rows, nb = _tile_geometry(total, max_block_rows)
    rows_padded = nb * block_rows
    pad = rows_padded * LANES - total
    x2 = jnp.pad(xf, (0, pad), constant_values=PAD_LOGIT).reshape(rows_padded, LANES)
    y2 = jnp.pad(yf, (0, pad), constant_values=0.0).reshape(rows_padded, LANES)

    def kernel(x_ref, y_ref, o_ref):
        o_ref[...] = _focal_terms(x_ref[...], y_ref[...], pos_weight, gamma, alpha)

    elems = rows_padded * LANES
    cost = pl.CostEstimate(flops=30 * elems, transcendentals=3 * elems,
                           bytes_accessed=3 * elems * 4)

    out = pl.pallas_call(
        kernel,
        out_shape=jax.ShapeDtypeStruct((rows_padded, LANES), jnp.float32),
        grid=(nb,),
        in_specs=[pl.BlockSpec((block_rows, LANES), lambda i: (i, 0)),
                  pl.BlockSpec((block_rows, LANES), lambda i: (i, 0))],
        out_specs=pl.BlockSpec((block_rows, LANES), lambda i: (i, 0)),
        compiler_params=pltpu.CompilerParams(
            dimension_semantics=("parallel",),
            vmem_limit_bytes=VMEM_LIMIT_BYTES),
        cost_estimate=cost,
    )(x2, y2)
    return out.reshape(-1)[:total].reshape(orig_shape)


class FocalLoss:
    """Pallas-TPU port of FocalLoss(nn.BCEWithLogitsLoss(reduction=..., pos_weight=pw), gamma, alpha)."""

    def __init__(self, gamma=1.5, alpha=0.25, reduction="mean", pos_weight=1.0,
                 max_block_rows=DEFAULT_BLOCK_ROWS):
        self.gamma = float(gamma)
        self.alpha = float(alpha)
        self.reduction = reduction
        self.pos_weight = float(pos_weight)
        self.max_block_rows = int(max_block_rows)

    def __call__(self, pred, true):
        if self.reduction == "none":
            return _focal_elementwise(pred, true, self.pos_weight, self.gamma, self.alpha,
                                      self.max_block_rows)
        s, total = _focal_reduce_sum(pred, true, self.pos_weight, self.gamma, self.alpha,
                                     self.max_block_rows)
        if self.reduction == "mean":
            return s / jnp.float32(total)
        return s  # 'sum'


# ----------------------------- pure-JAX reference (mirrors the PyTorch module) ---------------
def focal_loss_ref(pred, true, gamma=1.5, alpha=0.25, reduction="mean", pos_weight=1.0):
    pred = pred.astype(jnp.float32)
    true = true.astype(jnp.float32)
    loss = pos_weight * true * jax.nn.softplus(-pred) + (1.0 - true) * jax.nn.softplus(pred)
    pr = jax.nn.sigmoid(pred)
    p_t = true * pr + (1.0 - true) * (1.0 - pr)
    alpha_f = true * alpha + (1.0 - true) * (1.0 - alpha)
    mod = (1.0 - p_t) ** gamma
    loss = loss * alpha_f * mod
    if reduction == "mean":
        return jnp.mean(loss)
    if reduction == "sum":
        return jnp.sum(loss)
    return loss


# ----------------------------- main ----------------------------------------------------------
if __name__ == "__main__":
    key = jax.random.PRNGKey(0)
    k1, k2, k3, k4 = jax.random.split(key, 4)

    # Case 1: default FocalLoss(BCEWithLogitsLoss(), gamma=1.5, alpha=0.25), mean reduction.
    pred1 = 2.0 * jax.random.normal(k1, (2, 4, 16, 16), dtype=jnp.float32)
    true1 = (jax.random.uniform(k2, (2, 4, 16, 16)) < 0.3).astype(jnp.float32)
    out_mean = FocalLoss(gamma=1.5, alpha=0.25, reduction="mean")(pred1, true1)
    ref_mean = focal_loss_ref(pred1, true1, 1.5, 0.25, "mean")

    # Case 2: non-128-aligned size, soft labels, forced multi-block (exercises the padding
    # path, the 2-way 'parallel' grid split and the accumulator pipeline), sum reduction.
    pred2 = 3.0 * jax.random.normal(k3, (2, 3, 17, 23), dtype=jnp.float32)
    true2 = jax.random.uniform(k4, (2, 3, 17, 23), dtype=jnp.float32)
    out_sum = FocalLoss(gamma=1.5, alpha=0.25, reduction="sum", max_block_rows=8)(pred2, true2)
    ref_sum = focal_loss_ref(pred2, true2, 1.5, 0.25, "sum")

    # Case 3: reduction='none' elementwise kernel.
    out_none = FocalLoss(gamma=1.5, alpha=0.25, reduction="none")(pred1, true1)
    ref_none = focal_loss_ref(pred1, true1, 1.5, 0.25, "none")

    jax.block_until_ready((out_mean, out_sum, out_none))
    ok = (bool(jnp.allclose(out_mean, ref_mean, rtol=1e-3, atol=1e-6))
          and bool(jnp.allclose(out_sum, ref_sum, rtol=1e-3, atol=1e-5))
          and bool(jnp.allclose(out_none, ref_none, rtol=1e-3, atol=1e-6))
          and bool(jnp.isfinite(out_mean)) and bool(jnp.isfinite(out_sum))
          and bool(jnp.all(jnp.isfinite(out_none))))
    assert ok, (out_mean, ref_mean, out_sum, ref_sum)
    print("KERNEL_OK")
</pallas_src>

<mosaic_0001>
module attributes {stable_mosaic.version = 11 : i64} {
  func.func @kernel(%arg0: i32, %arg1: i32, %arg2: memref<1x16x128xf32, #tpu.memory_space<vmem>>, %arg3: memref<1x16x128xf32, #tpu.memory_space<vmem>>, %arg4: memref<1x1x1xf32, #tpu.memory_space<vmem>>) attributes {dimension_semantics = [#tpu.dimension_semantics<parallel>, #tpu.dimension_semantics<arbitrary>], iteration_bounds = array<i64: 1, 1>, scalar_prefetch = 0 : i64, scratch_operands = 0 : i64, tpu.core_type = #tpu.core_type<tc>, window_params = [{transform_indices = @transform_0, window_bounds = array<i64: 1, 16, 128>}, {transform_indices = @transform_1, window_bounds = array<i64: 1, 16, 128>}, {transform_indices = @transform_2, window_bounds = array<i64: 1, 1, 1>}]} {
    %c0_i32 = arith.constant 0 : i32
    %0 = arith.cmpi eq, %arg1, %c0_i32 : i32
    %1 = arith.extui %0 : i1 to i32
    %c0_i32_0 = arith.constant 0 : i32
    %2 = arith.cmpi ne, %1, %c0_i32_0 : i32
    scf.if %2 {
      %cst_26 = arith.constant 0.000000e+00 : f32
      %60 = vector.broadcast %cst_26 : f32 to vector<1x1x1xf32>
      %c0_27 = arith.constant 0 : index
      %c0_28 = arith.constant 0 : index
      %c0_29 = arith.constant 0 : index
      %61 = vector.load %arg4[%c0_27, %c0_28, %c0_29] : memref<1x1x1xf32, #tpu.memory_space<vmem>>, vector<1x1x1xf32>
      tpu.vector_store %arg4[%c0_27, %c0_28, %c0_29], %60 {strides = array<i32>} : memref<1x1x1xf32, #tpu.memory_space<vmem>>, vector<1x1x1xf32>,
    } else {
    }
    %c0 = arith.constant 0 : index
    %c0_1 = arith.constant 0 : index
    %c0_2 = arith.constant 0 : index
    %3 = vector.load %arg2[%c0, %c0_1, %c0_2] : memref<1x16x128xf32, #tpu.memory_space<vmem>>, vector<1x16x128xf32>
    %c0_3 = arith.constant 0 : index
    %c0_4 = arith.constant 0 : index
    %c0_5 = arith.constant 0 : index
    %4 = vector.load %arg3[%c0_3, %c0_4, %c0_5] : memref<1x16x128xf32, #tpu.memory_space<vmem>>, vector<1x16x128xf32>
    %5 = math.absf %3 : vector<1x16x128xf32>
    %cst = arith.constant 0.000000e+00 : f32
    %6 = vector.broadcast %cst : f32 to vector<1x16x128xf32>
    %7 = arith.subf %6, %5 : vector<1x16x128xf32>
    %8 = math.exp %7 : vector<1x16x128xf32>
    %cst_6 = arith.constant 1.000000e+00 : f32
    %9 = vector.broadcast %cst_6 : f32 to vector<1x16x128xf32>
    %10 = arith.addf %9, %8 : vector<1x16x128xf32>
    %11 = math.log %10 : vector<1x16x128xf32>
    %cst_7 = arith.constant 0.000000e+00 : f32
    %12 = vector.broadcast %cst_7 : f32 to vector<1x16x128xf32>
    %13 = arith.maximumf %3, %12 : vector<1x16x128xf32>
    %14 = arith.addf %13, %11 : vector<1x16x128xf32>
    %cst_8 = arith.constant 0.000000e+00 : f32
    %15 = vector.broadcast %cst_8 : f32 to vector<1x16x128xf32>
    %16 = arith.subf %15, %3 : vector<1x16x128xf32>
    %cst_9 = arith.constant 0.000000e+00 : f32
    %17 = vector.broadcast %cst_9 : f32 to vector<1x16x128xf32>
    %18 = arith.maximumf %16, %17 : vector<1x16x128xf32>
    %19 = arith.addf %18, %11 : vector<1x16x128xf32>
    %cst_10 = arith.constant 1.000000e+00 : f32
    %20 = vector.broadcast %cst_10 : f32 to vector<1x16x128xf32>
    %21 = arith.mulf %20, %4 : vector<1x16x128xf32>
    %22 = arith.mulf %21, %19 : vector<1x16x128xf32>
    %cst_11 = arith.constant 1.000000e+00 : f32
    %23 = vector.broadcast %cst_11 : f32 to vector<1x16x128xf32>
    %24 = arith.subf %23, %4 : vector<1x16x128xf32>
    %25 = arith.mulf %24, %14 : vector<1x16x128xf32>
    %26 = arith.addf %22, %25 : vector<1x16x128xf32>
    %cst_12 = arith.constant 1.000000e+00 : f32
    %27 = vector.broadcast %cst_12 : f32 to vector<1x16x128xf32>
    %28 = arith.addf %27, %8 : vector<1x16x128xf32>
    %cst_13 = arith.constant 1.000000e+00 : f32
    %29 = vector.broadcast %cst_13 : f32 to vector<1x16x128xf32>
    %30 = arith.divf %29, %28 : vector<1x16x128xf32>
    %31 = arith.mulf %8, %30 : vector<1x16x128xf32>
    %cst_14 = arith.constant 0.000000e+00 : f32
    %32 = vector.broadcast %cst_14 : f32 to vector<1x16x128xf32>
    %33 = arith.cmpf oge, %3, %32 : vector<1x16x128xf32>
    %34 = arith.select %33, %30, %31 : vector<1x16x128xi1>, vector<1x16x128xf32>
    %35 = arith.select %33, %31, %30 : vector<1x16x128xi1>, vector<1x16x128xf32>
    %36 = arith.mulf %4, %35 : vector<1x16x128xf32>
    %cst_15 = arith.constant 1.000000e+00 : f32
    %37 = vector.broadcast %cst_15 : f32 to vector<1x16x128xf32>
    %38 = arith.subf %37, %4 : vector<1x16x128xf32>
    %39 = arith.mulf %38, %34 : vector<1x16x128xf32>
    %40 = arith.addf %36, %39 : vector<1x16x128xf32>
    %cst_16 = arith.constant 2.500000e-01 : f32
    %41 = vector.broadcast %cst_16 : f32 to vector<1x16x128xf32>
    %42 = arith.mulf %4, %41 : vector<1x16x128xf32>
    %cst_17 = arith.constant 1.000000e+00 : f32
    %43 = vector.broadcast %cst_17 : f32 to vector<1x16x128xf32>
    %44 = arith.subf %43, %4 : vector<1x16x128xf32>
    %cst_18 = arith.constant 7.500000e-01 : f32
    %45 = vector.broadcast %cst_18 : f32 to vector<1x16x128xf32>
    %46 = arith.mulf %44, %45 : vector<1x16x128xf32>
    %47 = arith.addf %42, %46 : vector<1x16x128xf32>
    %48 = math.sqrt %40 : vector<1x16x128xf32>
    %49 = arith.mulf %40, %48 : vector<1x16x128xf32>
    %50 = arith.mulf %26, %47 : vector<1x16x128xf32>
    %51 = arith.mulf %50, %49 : vector<1x16x128xf32>
    %c0_19 = arith.constant 0 : index
    %c0_20 = arith.constant 0 : index
    %c0_21 = arith.constant 0 : index
    %52 = vector.load %arg4[%c0_19, %c0_20, %c0_21] : memref<1x1x1xf32, #tpu.memory_space<vmem>>, vector<1x1x1xf32>
    %53 = vector.shape_cast %51 : vector<1x16x128xf32> to vector<1x1x16x128xf32>
    %cst_22 = arith.constant dense<0.000000e+00> : vector<1xf32>
    %54 = vector.multi_reduction <add>, %53, %cst_22 [1, 2, 3] : vector<1x1x16x128xf32> to vector<1xf32>
    %55 = vector.shape_cast %54 : vector<1xf32> to vector<1x1x1x1xf32>
    %56 = vector.extract %55[0, 0, 0, 0] : f32 from vector<1x1x1x1xf32>
    %57 = vector.broadcast %56 : f32 to vector<1x1x1xf32>
    %58 = arith.addf %52, %57 : vector<1x1x1xf32>
    %c0_23 = arith.constant 0 : index
    %c0_24 = arith.constant 0 : index
    %c0_25 = arith.constant 0 : index
    %59 = vector.load %arg4[%c0_23, %c0_24, %c0_25] : memref<1x1x1xf32, #tpu.memory_space<vmem>>, vector<1x1x1xf32>
    tpu.vector_store %arg4[%c0_23, %c0_24, %c0_25], %58 {strides = array<i32>} : memref<1x1x1xf32, #tpu.memory_space<vmem>>, vector<1x1x1xf32>,
    return
  }
  func.func @transform_0(%arg0: i32, %arg1: i32) -> (i32, i32, i32) {
    %c1_i32 = arith.constant 1 : i32
    %0 = arith.muli %arg0, %c1_i32 : i32
    %1 = arith.addi %0, %arg1 : i32
    %c0_i32 = arith.constant 0 : i32
    %c0_i32_0 = arith.constant 0 : i32
    %c0_i32_1 = arith.constant 0 : i32
    return %1, %c0_i32, %c0_i32_0 : i32, i32, i32
  }
  func.func @transform_1(%arg0: i32, %arg1: i32) -> (i32, i32, i32) {
    %c1_i32 = arith.constant 1 : i32
    %0 = arith.muli %arg0, %c1_i32 : i32
    %1 = arith.addi %0, %arg1 : i32
    %c0_i32 = arith.constant 0 : i32
    %c0_i32_0 = arith.constant 0 : i32
    %c0_i32_1 = arith.constant 0 : i32
    return %1, %c0_i32, %c0_i32_0 : i32, i32, i32
  }
  func.func @transform_2(%arg0: i32, %arg1: i32) -> (i32, i32, i32) {
    %c0_i32 = arith.constant 0 : i32
    %c0_i32_0 = arith.constant 0 : i32
    %c0_i32_1 = arith.constant 0 : i32
    return %arg0, %c0_i32, %c0_i32_0 : i32, i32, i32
  }
}

</mosaic_0001>

<bundles_post_ra>
// kernel: tpu_custom_call.1
= control target key start
LH: loop header
LB: loop body
LE: loop exit
PB: predicated region body
PF: predicated region fallthrough
CT: control target
= control target key end

     0   :  { %7 = vsyncpa [#allocation3], 0  ;;  %s355_s0 = inlined_call_operand.hbm [shape: f32[1,16,128], index: 0, kind: input, shape index: {}]   ;;  %s356_s1 = inlined_call_operand.hbm [shape: f32[1,16,128], index: 1, kind: input, shape index: {}]   ;;  %s357_s2 = inlined_call_operand.hbm [shape: f32[1,1,1], index: 2, kind: output, shape index: {}]  }
   0x1   :  { %8 = vsyncpa [#allocation6], 0 }
   0x2   :  { %9 = vsyncpa [#allocation4], 0  ;;  %s18_s11 = sshll.u32 %s355_s0, 4  ;;  %s311_s12 = smov [#allocation2]   ;;  %s19_s11 = int_to_ptr.hbm [resolvable:$true] %s18_s11 }
   0x3   :  { %s20_s13 = sshll.u32 %s311_s12, 4  ;;  %s35_s16 = sshll.u32 %s356_s1, 4  ;;  %s21_s13 = int_to_ptr.vmem [resolvable:$true] %s20_s13  ;;  %s36_s16 = int_to_ptr.hbm [resolvable:$true] %s35_s16 }
   0x4   :  { %s312_s17 = smov 128   ;;  %s313_s18 = smov 8  }
   0x5   :  { %26 = dma.hbm_to_vmem [thread:$0]  %s19_s11, 256, %s21_s13, [#allocation3], %s312_s17, %s312_s17, %s313_s18  }
   0x6   :  { %s314_s19 = smov [#allocation5]  }
   0x7   :  { %s37_s20 = sshll.u32 %s314_s19, 4  ;;  %s38_s20 = int_to_ptr.vmem [resolvable:$true] %s37_s20 }
   0x8   :  { %43 = dma.hbm_to_vmem [thread:$0]  %s36_s16, 256, %s38_s20, [#allocation6], %s312_s17, %s312_s17, %s313_s18  }
   0x9   :  { %305 = dma.done.wait [#allocation3], 256  }
   0xa   :  { %306 = vsyncadd [#allocation3], 4294967040 }
   0xb   :  { %307 = dma.done.wait [#allocation6], 256  }
   0xc   :  { %308 = vsyncadd [#allocation6], 4294967040  ;;  %vm58_vm0 = vcmask 0   ;;  %v315_v0 = vmov 0.0   ;;  %v339_v1 = vld [vmem:[#allocation2] sm:$0xff]  ;;  %v341_v2 = vld [vmem:[#allocation2 + $0x8] sm:$0xff] }
   0xd   :  { %59 = vst.msk [vmem:[#allocation7] sm:$0x1] %vm58_vm0, %v315_v0  ;;  %v64_v3 = vand.u32 2147483647, %v339_v1  ;;  %v65_v4 = vand.u32 2147483647, %v341_v2 }
   0xe   :  { %v62_v26 = vld [vmem:[#allocation5] sm:$0xff]  ;;  %v63_v29 = vld [vmem:[#allocation5 + $0x8] sm:$0xff]  ;;  %vm128_vm9 = vcmp.ge.f32.partialorder %v339_v1, 0.0  ;;  %vm129_vm10 = vcmp.ge.f32.partialorder %v341_v2, 0.0  ;;  %v82_v48 = vsub.f32 0.0, %v339_v1  ;;  %v83_v51 = vsub.f32 0.0, %v341_v2 }
   0xf   :  { %v66_v5 = vsub.f32 0.0, %v64_v3  ;;  %v67_v6 = vsub.f32 0.0, %v65_v4  ;;  %v90_v32 = vsub.f32 1.0, %v62_v26  ;;  %v91_v35 = vsub.f32 1.0, %v63_v29  ;;  %s316_s0 = smov [#allocation7]   ;;  %s198_s23 = sshll.u32 %s357_s2, 4  ;;  %s199_s23 = int_to_ptr.hbm [resolvable:$true] %s198_s23 }
  0x10   :  { %v78_v54 = vmax.f32 %v339_v1, 0.0  ;;  %v84_v55 = vmax.f32 %v82_v48, 0.0  ;;  %v79_v57 = vmax.f32 %v341_v2, 0.0  ;;  %v85_v58 = vmax.f32 %v83_v51, 0.0  ;;  %s196_s1 = sshll.u32 %s316_s0, 4  ;;  %s197_s1 = int_to_ptr.vmem [resolvable:$true] %s196_s1 }
  0x11   :  { %v68_v7 = vmul.f32 1.442695, %v66_v5  ;;  %v70_v8 = vmul.f32 1.442695, %v67_v6  ;;  %v140_v6 = vmul.f32 0.25, %v62_v26 }
  0x13   :  { %217 = vpow2.f32 %v68_v7  ;;  %v141_v7 = vmul.f32 0.25, %v63_v29 }
  0x14   :  { %219 = vpow2.f32 %v70_v8  ;;  %v142_v8 = vmul.f32 0.75, %v90_v32 }
  0x19   :  { %v218_v9 = vpop.eup %217 }
  0x1a   :  { %v220_v10 = vpop.eup %219  ;;  %v72_v11 = vadd.f32 1.0, %v218_v9 }
  0x1b   :  { %v73_v12 = vadd.f32 1.0, %v220_v10 }
  0x1c   :  { %221 = vrcp.f32 %v72_v11  ;;  %vm101_vm1 = vweird.f32 %v72_v11  ;;  %v107_v16 = vand.u32 2147483648, %v72_v11  ;;  %v105_v19 = vand.u32 2147483647, %v72_v11 }
  0x1d   :  { %223 = vrcp.f32 %v73_v12  ;;  %v122_v20 = vand.u32 2147483648, %v73_v12  ;;  %vm116_vm3 = vweird.f32 %v73_v12  ;;  %v120_v22 = vand.u32 2147483647, %v73_v12 }
  0x1e   :  { %v108_v24 = vor.u32 1.1754944e-38, %v107_v16  ;;  %vm106_vm6 = vcmp.eq.f32.partialorder %v105_v19, 8.507059e+37  ;;  %225 = vlog2.f32 %v72_v11 }
  0x1f   :  { %v123_v28 = vor.u32 1.1754944e-38, %v122_v20  ;;  %vm121_vm8 = vcmp.eq.f32.partialorder %v120_v22, 8.507059e+37  ;;  %227 = vlog2.f32 %v73_v12 }
  0x22   :  { %v222_v13 = vpop.eup %221 }
  0x23   :  { %v224_v14 = vpop.eup %223  ;;  %v97_v15 = vmul.f32 %v222_v13, %v72_v11  ;;  %vm102_vm2 = vweird.f32 %v222_v13  ;;  %v143_v11 = vmul.f32 0.75, %v91_v35 }
  0x24   :  { %v112_v17 = vmul.f32 %v224_v14, %v73_v12  ;;  %vm117_vm4 = vweird.f32 %v224_v14  ;;  %vm103_vm5 = vmor %vm101_vm1, %vm102_vm2  ;;  %v226_v50 = vpop.eup %225 }
  0x25   :  { %v98_v18 = vsub.f32 1.0, %v97_v15  ;;  %vm118_vm7 = vmor %vm116_vm3, %vm117_vm4  ;;  %v228_v52 = vpop.eup %227  ;;  %v75_v53 = vmul.f32 0.6931472, %v226_v50  ;;  %v145_v19 = vadd.f32 %v143_v11, %v141_v7 }
  0x26   :  { %v113_v21 = vsub.f32 1.0, %v112_v17  ;;  %v77_v56 = vmul.f32 0.6931472, %v228_v52 }
  0x27   :  { %v99_v23 = vmul.f32 %v222_v13, %v98_v18  ;;  %v80_v61 = vadd.f32 %v78_v54, %v75_v53  ;;  %v86_v62 = vadd.f32 %v84_v55, %v75_v53  ;;  %v144_v18 = vadd.f32 %v142_v8, %v140_v6 }
  0x28   :  { %v114_v25 = vmul.f32 %v224_v14, %v113_v21  ;;  %v81_v0 = vadd.f32 %v79_v57, %v77_v56  ;;  %v87_v3 = vadd.f32 %v85_v58, %v77_v56 }
  0x29   :  { %v100_v27 = vadd.f32 %v222_v13, %v99_v23  ;;  %v92_v1 = vmul.f32 %v90_v32, %v80_v61 }
  0x2a   :  { %v115_v30 = vadd.f32 %v224_v14, %v114_v25  ;;  %v93_v2 = vmul.f32 %v91_v35, %v81_v0 }
  0x2b   :  { %v104_v31 = vsel %vm103_vm5, %v222_v13, %v100_v27  ;;  %v89_v13 = vmul.f32 %v87_v3, %v63_v29 }
  0x2c   :  { %v109_v33 = vsel %vm106_vm6, %v108_v24, %v104_v31  ;;  %v119_v34 = vsel %vm118_vm7, %v224_v14, %v115_v30 }
  0x2d   :  { %v124_v36 = vsel %vm121_vm8, %v123_v28, %v119_v34  ;;  %v126_v37 = vmul.f32 %v218_v9, %v109_v33  ;;  %v95_v21 = vadd.f32 %v93_v2, %v89_v13 }
  0x2e   :  { %v127_v38 = vmul.f32 %v220_v10, %v124_v36  ;;  %v88_v10 = vmul.f32 %v86_v62, %v62_v26 }
  0x2f   :  { %v130_v39 = vsel %vm128_vm9, %v109_v33, %v126_v37  ;;  %v132_v40 = vsel %vm128_vm9, %v126_v37, %v109_v33  ;;  %v173_v31 = vmul.f32 %v145_v19, %v95_v21 }
  0x30   :  { %v131_v41 = vsel %vm129_vm10, %v124_v36, %v127_v38  ;;  %v133_v42 = vsel %vm129_vm10, %v127_v38, %v124_v36  ;;  %v134_v43 = vmul.f32 %v132_v40, %v62_v26  ;;  %v136_v44 = vmul.f32 %v130_v39, %v90_v32 }
  0x31   :  { %v135_v45 = vmul.f32 %v133_v42, %v63_v29  ;;  %v137_v46 = vmul.f32 %v131_v41, %v91_v35  ;;  %v94_v17 = vadd.f32 %v92_v1, %v88_v10 }
  0x32   :  { %v138_v47 = vadd.f32 %v136_v44, %v134_v43 }
  0x33   :  { %v139_v49 = vadd.f32 %v137_v46, %v135_v45  ;;  %v172_v28 = vmul.f32 %v144_v18, %v94_v17  ;;  %v176_v45 = vld [vmem:[#allocation7] sm:$0x1] }
  0x34   :  { %229 = vrsqrt.f32 %v138_v47  ;;  %vm153_vm11 = vcmp.eq.f32.partialorder %v138_v47, inf  ;;  %v156_v22 = vand.u32 2147483648, %v138_v47  ;;  %vm155_vm12 = vcmp.eq.f32.partialorder %v138_v47, 0.0 }
  0x35   :  { %231 = vrsqrt.f32 %v139_v49  ;;  %vm165_vm13 = vcmp.eq.f32.partialorder %v139_v49, inf  ;;  %v168_v25 = vand.u32 2147483648, %v139_v49  ;;  %vm167_vm14 = vcmp.eq.f32.partialorder %v139_v49, 0.0 }
  0x3a   :  { %v230_v59 = vpop.eup %229 }
  0x3b   :  { %v232_v60 = vpop.eup %231  ;;  %v147_v63 = vmul.f32 %v230_v59, %v138_v47 }
  0x3c   :  { %v159_v4 = vmul.f32 %v232_v60, %v139_v49 }
  0x3d   :  { %v148_v5 = vmul.f32 %v230_v59, %v147_v63 }
  0x3e   :  { %v160_v9 = vmul.f32 %v232_v60, %v159_v4 }
  0x3f   :  { %v149_v12 = vmul.f32 0.5, %v148_v5 }
  0x40   :  { %v161_v14 = vmul.f32 0.5, %v160_v9 }
  0x41   :  { %v150_v15 = vsub.f32 1.5, %v149_v12 }
  0x42   :  { %v162_v16 = vsub.f32 1.5, %v161_v14 }
  0x43   :  { %v151_v20 = vmul.f32 %v230_v59, %v150_v15 }
  0x44   :  { %v163_v23 = vmul.f32 %v232_v60, %v162_v16 }
  0x45   :  { %v152_v24 = vmul.f32 %v151_v20, %v138_v47 }
  0x46   :  { %v164_v26 = vmul.f32 %v163_v23, %v139_v49 }
  0x47   :  { %v154_v27 = vsel %vm153_vm11, %v138_v47, %v152_v24 }
  0x48   :  { %v157_v29 = vsel %vm155_vm12, %v156_v22, %v154_v27  ;;  %v166_v30 = vsel %vm165_vm13, %v139_v49, %v164_v26 }
  0x49   :  { %v169_v32 = vsel %vm167_vm14, %v168_v25, %v166_v30  ;;  %v170_v33 = vmul.f32 %v157_v29, %v138_v47 }
  0x4a   :  { %v171_v34 = vmul.f32 %v169_v32, %v139_v49 }
  0x4b   :  { %v174_v35 = vmul.f32 %v172_v28, %v170_v33 }
  0x4c   :  { %v175_v36 = vmul.f32 %v173_v31, %v171_v34 }
  0x4e   :  { %v177_v37 = vadd.f32 %v175_v36, %v174_v35 }
  0x50   :  { %178 = vadd.xlane.f32.xlu0 %v177_v37 }
  0xc3   :  { %v179_v38 = vpop.xlane.xlu0 %178 }
  0xc4   :  { %v180_v39 = vrot.slane %v179_v38, 4 }
  0xc6   :  { %v181_v40 = vadd.f32 %v180_v39, %v179_v38 }
  0xc8   :  { %v182_v41 = vrot.slane %v181_v40, 2 }
  0xca   :  { %v183_v42 = vadd.f32 %v182_v41, %v181_v40 }
  0xcc   :  { %v184_v43 = vrot.slane %v183_v42, 1 }
  0xce   :  { %v185_v44 = vadd.f32 %v184_v43, %v183_v42 }
  0xd0   :  { %209 = vpush %v185_v44 }
 0x101   :  { %s210_s24 = spop %209 }
 0x102   :  { %v187_v46 = vstv %s210_s24 }
 0x103   :  { %v188_v47 = vadd.f32 %v187_v46, %v176_v45 }
 0x105   :  { %190 = vst.msk [vmem:[#allocation7] sm:$0x1] %vm58_vm0, %v188_v47 }
 0x106   :  { %201 = dma.vmem_to_hbm [thread:$0]  %s197_s1, 16, %s199_s23, [#allocation4]  }
 0x107   :  { %309 = dma.done.wait [#allocation4], 16  }
 0x108   :  { %310 = vsyncadd [#allocation4], 4294967280 }
 0x109   :  { %206 = vsyncpa [#allocation3], 1 }
 0x10a   :  { %207 = vsyncpa [#allocation6], 1 }
 0x10b   :  { %208 = vsyncpa [#allocation4], 1 }

</bundles_post_ra>
